<compile_context>
chip_gen: v5e
topology: v5e:2x2
jax: 0.10.0
libtpu: 0.0.40
codegen_flags: <defaults>
</compile_context>

<pallas_src>
import math

import jax
import jax.numpy as jnp
from jax.experimental import pallas as pl
from jax.experimental.pallas import tpu as pltpu


def _vmem_physical_bytes():
    """Physical VMEM per TensorCore; conservative (v7x = 64 MiB) fallback."""
    try:
        info = pltpu.get_tpu_info()
        return int(getattr(info, "vmem_capacity_bytes", 64 * 1024 * 1024))
    except Exception:
        return 64 * 1024 * 1024


def _round_down(x, m):
    return (x // m) * m


def _choose_tiles(n, d, m1, m2, itemsize, budget):
    """Pick (Nb, Db): batch rows / local layers processed per grid step."""

    def block_bytes(nb, db):
        # x tile + its in-kernel transposed copy, weight tile, bias tile,
        # f32 accumulator, out tile + its pre-store transposed copy.
        return (2 * nb * db * m1 * itemsize
                + db * m1 * m2 * itemsize
                + db * m2 * itemsize
                + nb * db * m2 * 4
                + 2 * nb * db * m2 * itemsize)

    # 1) Whole problem in a single block?  Still split d (if alignment allows)
    #    so the "parallel" d axis can feed both v7x TensorCores.
    if block_bytes(n, d) <= budget:
        if d >= 16:
            half = _round_down((d + 1) // 2, 8)
            if half >= 8:
                return n, half
        return n, d

    # 2) Keep the full batch per step, tile d (block_bytes is linear in db).
    db = int(budget // max(block_bytes(n, 1), 1))
    if db >= d:
        return n, d
    if db >= 8:
        return n, _round_down(db, 8)

    # 3) Even 8 layers with the full batch don't fit -> tile n as well.
    db = min(8, d)                                   # multiple of 8, or == d
    fixed = db * (m1 * m2 + m2) * itemsize           # weight + bias bytes
    per_n = db * (2 * m1 * itemsize + m2 * (4 + 2 * itemsize))
    nb = int((budget - fixed) // max(per_n, 1))
    nb = max(1, min(n, nb))
    if nb >= 8:
        nb = _round_down(nb, 8)
    return nb, db


def _lc_kernel_bias(x_ref, w_ref, b_ref, o_ref):
    # x_ref: (Nb, Db, m1)  w_ref: (Db, m1, m2)  b_ref: (Db, m2)  o_ref: (Nb, Db, m2)
    xb = jnp.transpose(x_ref[...], (1, 0, 2))                     # (Db, Nb, m1)
    acc = jax.lax.dot_general(                                    # MXU, f32 acc
        xb, w_ref[...],
        dimension_numbers=(((2,), (1,)), ((0,), (0,))),
        preferred_element_type=jnp.float32)                       # (Db, Nb, m2)
    acc = acc + b_ref[...][:, None, :].astype(jnp.float32)
    o_ref[...] = jnp.transpose(acc.astype(o_ref.dtype), (1, 0, 2))


def _lc_kernel_nobias(x_ref, w_ref, o_ref):
    xb = jnp.transpose(x_ref[...], (1, 0, 2))
    acc = jax.lax.dot_general(
        xb, w_ref[...],
        dimension_numbers=(((2,), (1,)), ((0,), (0,))),
        preferred_element_type=jnp.float32)
    o_ref[...] = jnp.transpose(acc.astype(o_ref.dtype), (1, 0, 2))


def locally_connected(x, weight, bias=None, *, block_d=None, block_n=None):
    """x: [n, d, m1], weight: [d, m1, m2], bias: [d, m2] or None -> [n, d, m2]."""
    n, d, m1 = x.shape
    d_w, m1_w, m2 = weight.shape
    assert d == d_w and m1 == m1_w
    if bias is not None:
        assert bias.shape == (d, m2)

    itemsize = max(jnp.dtype(x.dtype).itemsize, jnp.dtype(weight.dtype).itemsize)

    # Generation-aware sizing: one pipeline stage's blocks get ~1/4 of physical
    # VMEM (double-buffering doubles it); scoped limit raised with headroom.
    phys_vmem = _vmem_physical_bytes()
    tile_budget = max(4 * 1024 * 1024, phys_vmem // 4)
    vmem_limit = int(min(phys_vmem - (8 << 20), 2 * tile_budget + (16 << 20)))

    nb, db = _choose_tiles(n, d, m1, m2, itemsize, tile_budget)
    # Optional overrides (sanitized to keep the (8,128) block rule valid).
    if block_d is not None:
        db = d if block_d >= d else max(8, _round_down(block_d, 8))
        db = min(db, d)
    if block_n is not None:
        nb = max(1, min(n, int(block_n)))

    grid = (pl.cdiv(d, db), pl.cdiv(n, nb))   # d outer, n inner: weights stay resident

    x_spec = pl.BlockSpec((nb, db, m1), lambda j, i: (i, j, 0))
    w_spec = pl.BlockSpec((db, m1, m2), lambda j, i: (j, 0, 0))
    o_spec = pl.BlockSpec((nb, db, m2), lambda j, i: (i, j, 0))

    if bias is None:
        kernel = _lc_kernel_nobias
        in_specs = [x_spec, w_spec]
        args = (x, weight)
    else:
        kernel = _lc_kernel_bias
        in_specs = [x_spec, w_spec, pl.BlockSpec((db, m2), lambda j, i: (j, 0))]
        args = (x, weight, bias)

    return pl.pallas_call(
        kernel,
        out_shape=jax.ShapeDtypeStruct((n, d, m2), x.dtype),
        grid_spec=pltpu.PrefetchScalarGridSpec(
            num_scalar_prefetch=0,
            grid=grid,
            in_specs=in_specs,
            out_specs=o_spec,
        ),
        compiler_params=pltpu.CompilerParams(
            dimension_semantics=("parallel", "parallel"),
            vmem_limit_bytes=vmem_limit,
        ),
    )(*args)


def init_params(key, num_linear, input_features, output_features, dtype=jnp.float32):
    """Deterministic init matching nn.init.uniform_(-sqrt(1/m1), sqrt(1/m1))."""
    bound = math.sqrt(1.0 / input_features)
    kw, kb = jax.random.split(key)
    weight = jax.random.uniform(
        kw, (num_linear, input_features, output_features),
        minval=-bound, maxval=bound, dtype=dtype)
    bias = jax.random.uniform(
        kb, (num_linear, output_features),
        minval=-bound, maxval=bound, dtype=dtype)
    return weight, bias


if __name__ == "__main__":
    key = jax.random.PRNGKey(0)
    k1, k2, k3, k4, k5, k6 = jax.random.split(key, 6)

    # --- Test 1: typical module shapes (n=2, d=4, m1=16, m2=8), single block.
    n, d, m1, m2 = 2, 4, 16, 8
    x = jax.random.normal(k1, (n, d, m1), dtype=jnp.float32)
    weight, bias = init_params(k2, d, m1, m2)
    out = jax.block_until_ready(locally_connected(x, weight, bias))
    ref = jnp.einsum("ndk,dko->ndo", x, weight) + bias[None, :, :]
    assert out.shape == (n, d, m2)
    assert jnp.allclose(out, ref, atol=1e-5, rtol=1e-5)

    # --- Test 2: larger d with forced small d-blocks (multi-block grid path).
    n2, d2, m12, m22 = 8, 32, 16, 8
    x2 = jax.random.normal(k3, (n2, d2, m12), dtype=jnp.float32)
    weight2, bias2 = init_params(k4, d2, m12, m22)
    out2 = jax.block_until_ready(locally_connected(x2, weight2, bias2, block_d=8))
    ref2 = jnp.einsum("ndk,dko->ndo", x2, weight2) + bias2[None, :, :]
    assert out2.shape == (n2, d2, m22)
    assert jnp.allclose(out2, ref2, atol=1e-5, rtol=1e-5)

    # --- Test 3: no-bias path, 2-D grid (tiled n and d, padded last n-block).
    n3, d3, m13, m23 = 12, 24, 16, 8
    x3 = jax.random.normal(k5, (n3, d3, m13), dtype=jnp.float32)
    weight3, _ = init_params(k6, d3, m13, m23)
    out3 = jax.block_until_ready(
        locally_connected(x3, weight3, None, block_d=8, block_n=8))
    ref3 = jnp.einsum("ndk,dko->ndo", x3, weight3)
    assert out3.shape == (n3, d3, m23)
    assert jnp.allclose(out3, ref3, atol=1e-5, rtol=1e-5)

    print("KERNEL_OK")
</pallas_src>

<mosaic_0001>
module attributes {stable_mosaic.version = 11 : i64} {
  func.func @_lc_kernel_bias(%arg0: i32, %arg1: i32, %arg2: memref<2x4x16xf32, #tpu.memory_space<vmem>>, %arg3: memref<4x16x8xf32, #tpu.memory_space<vmem>>, %arg4: memref<4x8xf32, #tpu.memory_space<vmem>>, %arg5: memref<2x4x8xf32, #tpu.memory_space<vmem>>) attributes {dimension_semantics = [#tpu.dimension_semantics<parallel>, #tpu.dimension_semantics<parallel>], iteration_bounds = array<i64: 1, 1>, scalar_prefetch = 0 : i64, scratch_operands = 0 : i64, tpu.core_type = #tpu.core_type<tc>, window_params = [{transform_indices = @transform_0, window_bounds = array<i64: 2, 4, 16>}, {transform_indices = @transform_1, window_bounds = array<i64: 4, 16, 8>}, {transform_indices = @transform_2, window_bounds = array<i64: 4, 8>}, {transform_indices = @transform_3, window_bounds = array<i64: 2, 4, 8>}]} {
    %c0 = arith.constant 0 : index
    %c0_0 = arith.constant 0 : index
    %c0_1 = arith.constant 0 : index
    %0 = vector.load %arg2[%c0, %c0_0, %c0_1] : memref<2x4x16xf32, #tpu.memory_space<vmem>>, vector<2x4x16xf32>
    %1 = tpu.transpose %0, [1, 0, 2] : vector<2x4x16xf32> -> vector<4x2x16xf32>
    %c0_2 = arith.constant 0 : index
    %c0_3 = arith.constant 0 : index
    %c0_4 = arith.constant 0 : index
    %2 = vector.load %arg3[%c0_2, %c0_3, %c0_4] : memref<4x16x8xf32, #tpu.memory_space<vmem>>, vector<4x16x8xf32>
    %cst = arith.constant dense<0.000000e+00> : vector<4x2x8xf32>
    %3 = tpu.matmul %1, %2, %cst {dimension_numbers = #tpu.dot_dimension_numbers<[2], [1], [1], [2], [0, 0, 0, 1, 1, 2], [0], [0]>} : vector<4x2x16xf32>, vector<4x16x8xf32>, vector<4x2x8xf32> -> vector<4x2x8xf32>
    %c0_5 = arith.constant 0 : index
    %c0_6 = arith.constant 0 : index
    %4 = vector.load %arg4[%c0_5, %c0_6] : memref<4x8xf32, #tpu.memory_space<vmem>>, vector<4x8xf32>
    %5 = vector.shape_cast %4 : vector<4x8xf32> to vector<4x1x8xf32>
    %6 = vector.broadcast %5 : vector<4x1x8xf32> to vector<4x2x8xf32>
    %7 = arith.addf %3, %6 : vector<4x2x8xf32>
    %8 = tpu.transpose %7, [1, 0, 2] : vector<4x2x8xf32> -> vector<2x4x8xf32>
    %c0_7 = arith.constant 0 : index
    %c0_8 = arith.constant 0 : index
    %c0_9 = arith.constant 0 : index
    %9 = vector.load %arg5[%c0_7, %c0_8, %c0_9] : memref<2x4x8xf32, #tpu.memory_space<vmem>>, vector<2x4x8xf32>
    tpu.vector_store %arg5[%c0_7, %c0_8, %c0_9], %8 {strides = array<i32>} : memref<2x4x8xf32, #tpu.memory_space<vmem>>, vector<2x4x8xf32>,
    return
  }
  func.func @transform_0(%arg0: i32, %arg1: i32) -> (i32, i32, i32) {
    %c0_i32 = arith.constant 0 : i32
    %c0_i32_0 = arith.constant 0 : i32
    return %arg1, %arg0, %c0_i32 : i32, i32, i32
  }
  func.func @transform_1(%arg0: i32, %arg1: i32) -> (i32, i32, i32) {
    %c0_i32 = arith.constant 0 : i32
    %c0_i32_0 = arith.constant 0 : i32
    %c0_i32_1 = arith.constant 0 : i32
    return %arg0, %c0_i32, %c0_i32_0 : i32, i32, i32
  }
  func.func @transform_2(%arg0: i32, %arg1: i32) -> (i32, i32) {
    %c0_i32 = arith.constant 0 : i32
    %c0_i32_0 = arith.constant 0 : i32
    return %arg0, %c0_i32 : i32, i32
  }
  func.func @transform_3(%arg0: i32, %arg1: i32) -> (i32, i32, i32) {
    %c0_i32 = arith.constant 0 : i32
    %c0_i32_0 = arith.constant 0 : i32
    return %arg1, %arg0, %c0_i32 : i32, i32, i32
  }
}

</mosaic_0001>

<bundles_post_ra>
// kernel: tpu_custom_call.1
= control target key start
LH: loop header
LB: loop body
LE: loop exit
PB: predicated region body
PF: predicated region fallthrough
CT: control target
= control target key end

     0   :  { %vm26_vm0 = vcmask 1047556   ;;  %v234_v4 = vmov 1934713408   ;;  %s303_s0 = inlined_call_operand.vmem [shape: f32[2,4,16], index: 0, kind: input, shape index: {}]   ;;  %s304_s1 = inlined_call_operand.vmem [shape: f32[4,16,8], index: 1, kind: input, shape index: {}]   ;;  %s305_s2 = inlined_call_operand.vmem [shape: f32[4,8], index: 2, kind: input, shape index: {}]   ;;  %s306_s3 = inlined_call_operand.hbm [shape: f32[2,4,8], index: 3, kind: output, shape index: {}]  }
   0x1   :  { %v49_v0 = vld [vmem:[%s304_s1 + $0x38] sm:$0xff]  ;;  %v47_v1 = vld [vmem:[%s304_s1 + $0x28] sm:$0xff]  ;;  %v48_v2 = vld [vmem:[%s304_s1 + $0x30] sm:$0xff]  ;;  %v31_v5 = vunpack.c.l.s4 %v234_v4 }
   0x2   :  { %150 = vmatpush.msra.mxu3 %v49_v0  ;;  %127 = vmatpush.msra.mxu2 %v47_v1  ;;  %v197_v3 = vld.sshfl [vmem:[%s303_s0] sm:$0x33 pattern:$0x76325410]  ;;  %v45_v9 = vld [vmem:[%s304_s1 + $0x18] sm:$0xff]  ;;  %v43_v12 = vld [vmem:[%s304_s1 + $0x8] sm:$0xff] }
   0x3   :  { %v46_v6 = vld [vmem:[%s304_s1 + $0x20] sm:$0xff]  ;;  %v28_v8 = vrot.slane %v197_v3, 4  ;;  %v32_v11 = vunpack.c.0.s8 %v31_v5  ;;  %v44_v13 = vld [vmem:[%s304_s1 + $0x10] sm:$0xff]  ;;  %104 = vmatpush.msra.mxu1 %v45_v9  ;;  %81 = vmatpush.msra.mxu0 %v43_v12 }
   0x4   :  { %v198_v7 = vld.sshfl [vmem:[%s303_s0 + $0x4] sm:$0x33 pattern:$0x76325410]  ;;  %151 = vmatpush.msra.mxu3 %v48_v2  ;;  %128 = vmatpush.msra.mxu2 %v46_v6 }
   0x5   :  { %v25_v10 = vrot.slane %v198_v7, 4  ;;  %v42_v14 = vld [vmem:[%s304_s1] sm:$0xff]  ;;  %v29_v15 = vsel %vm26_vm0, %v198_v7, %v28_v8 }
   0x6   :  { %8 = vsyncpa [#allocation3], 0  ;;  %v37_v16 = vperm.slane %v29_v15, %v32_v11  ;;  %vm63_vm1 = vcmask 130048   ;;  %105 = vmatpush.msra.mxu1 %v44_v13  ;;  %82 = vmatpush.msra.mxu0 %v42_v14  ;;  %v50_v23 = vld [vmem:[%s305_s2] sm:$0xf]  ;;  %vm176_vm2 = vcmask 60416  }
   0x7   :  { %v27_v17 = vsel %vm26_vm0, %v25_v10, %v197_v3  ;;  %v53_v24 = vrot.slane %v50_v23, 2  ;;  %v54_v25 = vrot.slane %v50_v23, 3  ;;  %v52_v26 = vrot.slane %v50_v23, 1  ;;  %s236_s2 = smov [#allocation2]   ;;  %s185_s8 = sshll.u32 %s306_s3, 4  ;;  %s186_s8 = int_to_ptr.hbm [resolvable:$true] %s185_s8 }
   0x8   :  { %v33_v18 = vperm.slane %v27_v17, %v32_v11  ;;  %v40_v19 = vrot.slane %v37_v16, 4  ;;  %201 = vmatmul.msk.f32.vlgmr.msra.gmra.mxu2 %vm63_vm1, %v37_v16  ;;  %v55_v28 = vperm.slane %v50_v23, 0  ;;  %v235_v34 = vmov 1983009808   ;;  %s183_s5 = sshll.u32 %s236_s2, 4  ;;  %s237_s9 = smov 64   ;;  %s184_s5 = int_to_ptr.vmem [resolvable:$true] %s183_s5 }
   0x9   :  { %v57_v27 = vperm.slane %v53_v24, 0  ;;  %v58_v30 = vperm.slane %v54_v25, 0  ;;  %v56_v31 = vperm.slane %v52_v26, 0  ;;  %v159_v35 = vunpack.c.l.s4 %v235_v34  ;;  %s238_s10 = smov 4  }
   0xa   :  { %v38_v20 = vrot.slane %v33_v18, 4  ;;  %199 = vmatmul.msk.f32.vlgmr.msra.gmra.mxu0 %vm63_vm1, %v33_v18  ;;  %v41_v21 = vsel %vm26_vm0, 0.0, %v40_v19 }
   0xb   :  { %202 = vmatmul.msk.f32.vlgmr.msra.gmra.mxu3 %vm63_vm1, %v41_v21  ;;  %v160_v42 = vunpack.c.0.s8 %v159_v35 }
   0xc   :  { %v39_v22 = vsel %vm26_vm0, 0.0, %v38_v20 }
   0xd   :  { %200 = vmatmul.msk.f32.vlgmr.msra.gmra.mxu1 %vm63_vm1, %v39_v22 }
  0x87   :  { %v84_v29 = vpop.f32.mrf.mxu0 }
  0x88   :  { %v85_v37 = vadd.f32 %v84_v29, %v55_v28 }
  0x8a   :  { %v107_v33 = vpop.f32.mrf.mxu1 }
  0x8b   :  { %v130_v32 = vpop.f32.mrf.mxu2  ;;  %v108_v41 = vadd.f32 %v107_v33, %v56_v31 }
  0x8c   :  { %v131_v36 = vadd.f32 %v130_v32, %v57_v27 }
  0x8e   :  { %v153_v38 = vpop.f32.mrf.mxu3  ;;  %v156_v39 = vrot.slane %v131_v36, 4 }
  0x8f   :  { %v154_v40 = vadd.f32 %v153_v38, %v58_v30 }
  0x90   :  { %v157_v44 = vsel %vm26_vm0, %v156_v39, %v85_v37 }
  0x91   :  { %v162_v43 = vrot.slane %v154_v40, 4  ;;  %v161_v47 = vperm.slane %v157_v44, %v160_v42 }
  0x93   :  { %v163_v45 = vsel %vm26_vm0, %v162_v43, %v108_v41 }
  0x94   :  { %v167_v46 = vperm.slane %v163_v45, %v160_v42 }
  0x96   :  { %v168_v48 = vrot.slane %v167_v46, 4 }
  0x98   :  { %v169_v49 = vsel %vm26_vm0, %v168_v48, %v161_v47 }
  0x99   :  { %v173_v50 = vperm.slane %v169_v49, %v32_v11 }
  0x9b   :  { %v174_v51 = vrot.slane %v173_v50, 4  ;;  %177 = vst.msk [vmem:[#allocation2] sm:$0xf] %vm176_vm2, %v173_v50 }
  0x9d   :  { %v175_v52 = vsel %vm26_vm0, 0.0, %v174_v51 }
  0x9e   :  { %178 = vst.msk [vmem:[#allocation2 + $0x4] sm:$0xf] %vm176_vm2, %v175_v52 }
  0x9f   :  { %191 = dma.vmem_to_hbm [thread:$0]  %s184_s5, 128, %s186_s8, [#allocation3], %s237_s9, %s237_s9, %s238_s10  }
  0xa0   :  { %232 = dma.done.wait [#allocation3], 128  }
  0xa1   :  { %233 = vsyncadd [#allocation3], 4294967168 }
  0xa2   :  { %196 = vsyncpa [#allocation3], 1 }

</bundles_post_ra>
